<compile_context>
chip_gen: v5e
topology: v5e:2x2
jax: 0.10.0
libtpu: 0.0.40
codegen_flags: <defaults>
</compile_context>

<pallas_src>
import functools

import jax
import jax.numpy as jnp
from jax.experimental import pallas as pl
from jax.experimental.pallas import tpu as pltpu


def _round_up(x, m):
    return ((x + m - 1) // m) * m


# Sublane multiple per element size (f32 -> 8, bf16 -> 16, int8 -> 32).
_SUBLANE = {4: 8, 2: 16, 1: 32}


def _pick_pixels_per_tile(num_classes, hw, batch, in_itemsize, *, packed,
                          budget_bytes=24 * 1024 * 1024,
                          max_pixels=256 * 1024,
                          min_parallel_steps=8):
    """Pick pixels-per-grid-step from a dtype/layout-aware VMEM budget.

    Accounts for:
      * double-buffered input blocks (logits in their native dtype, labels
        worst-case int32; the 3-D fallback's label block is sublane-padded),
      * ~4 live (C, tile) f32 temporaries inside the kernel plus a handful of
        (1, tile) rows and the onehot bool,
    and caps the tile so that (a) it never exceeds `max_pixels` and (b) the
    grid keeps >= ~min_parallel_steps steps total when the problem allows it
    (v7x has 2 TensorCores).
    """
    if packed:
        c_blk = num_classes            # class axis is NOT the sublane axis
        c_tmp = num_classes
        lbl_blk = 2 * 4                # (rows, 128) label block, <= int32
        granule = 8 * 128              # 8 sublane rows x 128 lanes
    else:
        c_blk = _round_up(num_classes, _SUBLANE.get(in_itemsize, 8))
        c_tmp = _round_up(num_classes, 8)
        lbl_blk = 2 * 4 * 8            # (1, tile) block padded to 8 sublanes
        granule = 128

    per_pixel = (2 * c_blk * in_itemsize     # double-buffered logits block
                 + lbl_blk                   # double-buffered labels block
                 + 4 * c_tmp * 4             # live f32 temporaries
                 + c_tmp                     # onehot bool
                 + 8 * 4)                    # (1, tile)-shaped rows

    t = budget_bytes // per_pixel
    t = min(t, max_pixels)

    # Keep enough grid steps for both v7x TensorCores when the problem allows.
    want_tiles = max(1, (min_parallel_steps + batch - 1) // batch)
    t = min(t, (hw + want_tiles - 1) // want_tiles)

    t = max(granule, (t // granule) * granule)
    t = min(t, _round_up(hw, granule))
    return int(t)


def _combined_loss_kernel(p_ref, t_ref, o_ref, *, hw, pixels_per_tile, ragged):
    """One (batch, pixel-chunk) grid step -> partial (intersection, ce_sum).

    Works for both layouts:
      packed:  p_ref block (1, C, rows, 128), t_ref block (1, 1, rows, 128)
      ragged:  p_ref block (1, C, tile_n),    t_ref block (1, 1, tile_n)
    """
    i = pl.program_id(1)

    def run(apply_mask):
        p = p_ref[0].astype(jnp.float32)        # (C, rows, 128) or (C, tile_n)
        t = t_ref[0].astype(jnp.int32)          # (1, rows, 128) or (1, tile_n)
        pix_shape = (1,) + p.shape[1:]

        if apply_mask:
            # Flat pixel index inside this tile -> global pixel index.
            if p.ndim == 3:
                lanes = p.shape[2]
                row = jax.lax.broadcasted_iota(jnp.int32, pix_shape, 1)
                lane = jax.lax.broadcasted_iota(jnp.int32, pix_shape, 2)
                flat = row * lanes + lane
            else:
                flat = jax.lax.broadcasted_iota(jnp.int32, pix_shape, 1)
            valid = (i * pixels_per_tile + flat) < hw
            validf = valid.astype(jnp.float32)
            # Zero padded logits so exp/log stay finite on stale VMEM data.
            p = jnp.where(valid, p, 0.0)

        # One-hot selection of the true-class logit (reduce over class axis 0).
        onehot = jax.lax.broadcasted_iota(jnp.int32, p.shape, 0) == t
        sel = jnp.sum(jnp.where(onehot, p, 0.0), axis=0, keepdims=True)

        # Log-sum-exp pieces; softmax itself is never materialized.
        m = jnp.max(p, axis=0, keepdims=True)
        e = jnp.exp(p - m)
        s = jnp.sum(e, axis=0, keepdims=True)

        # softmax prob of the true class (dice intersection contribution).
        inter_row = jnp.exp(sel - m) / s
        # -log softmax[true class] (cross-entropy contribution).
        ce_row = m + jnp.log(s) - sel
        if apply_mask:
            inter_row = inter_row * validf
            ce_row = ce_row * validf

        inter_p = jnp.sum(inter_row)
        ce_p = jnp.sum(ce_row)

        # Lane-dense (8, 128) output tile: [0,0]=intersection, [0,1]=CE.
        sub = jax.lax.broadcasted_iota(jnp.int32, (8, 128), 0)
        lan = jax.lax.broadcasted_iota(jnp.int32, (8, 128), 1)
        tile = jnp.where((sub == 0) & (lan == 0), inter_p,
                         jnp.where((sub == 0) & (lan == 1), ce_p, 0.0))
        o_ref[...] = tile[None, None]

    if not ragged:
        run(False)                      # evenly tiled -> no mask anywhere
    else:
        last = pl.num_programs(1) - 1

        @pl.when(i != last)
        def _():
            run(False)                  # interior tiles: mask-free fast path

        @pl.when(i == last)
        def _():
            run(True)                   # only the last tile pays for the mask


def combined_loss(predictions, targets, *, dice_weight=0.5, ce_weight=0.5,
                  smooth=1e-6):
    """predictions: (B, C, H, W) float logits; targets: (B, H, W) int labels."""
    # TODO(synk): class_weights for the CE term not implemented (module default is None).
    # TODO(synk): no ignore_index handling; targets are assumed to be valid class ids.
    B, C, H, W = predictions.shape
    HW = H * W
    N = B * HW
    itemsize = predictions.dtype.itemsize
    packed = (HW % 128 == 0)

    if packed:
        # Free reshapes: sublane axis = pixel rows, so small C wastes nothing.
        R = HW // 128
        t_pixels = _pick_pixels_per_tile(C, HW, B, itemsize, packed=True)
        tile_rows = max(8, t_pixels // 128)
        if tile_rows >= R:
            tile_rows = R
        elif tile_rows >= 32 and tile_rows % 32:
            tile_rows = (tile_rows // 32) * 32   # keep int8 labels well tiled
        n_tiles = pl.cdiv(R, tile_rows)
        pixels_per_tile = tile_rows * 128
        ragged = (R % tile_rows) != 0
        lbl_dtype = jnp.int8 if (C <= 128 and tile_rows % 32 == 0) else jnp.int32
        p_in = predictions.reshape(B, C, R, 128)
        t_in = targets.reshape(B, 1, R, 128).astype(lbl_dtype)
        in_specs = [
            pl.BlockSpec((1, C, tile_rows, 128), lambda b, i: (b, 0, i, 0)),
            pl.BlockSpec((1, 1, tile_rows, 128), lambda b, i: (b, 0, i, 0)),
        ]
    else:
        # Ragged-HW fallback: flat pixel axis, last tile masked.
        t_pixels = _pick_pixels_per_tile(C, HW, B, itemsize, packed=False)
        hw_up = _round_up(HW, 128)
        tile_n = min(t_pixels, hw_up)
        n_tiles = pl.cdiv(HW, tile_n)
        pixels_per_tile = tile_n
        ragged = (HW % tile_n) != 0
        p_in = predictions.reshape(B, C, HW)
        t_in = targets.reshape(B, 1, HW).astype(jnp.int32)
        in_specs = [
            pl.BlockSpec((1, C, tile_n), lambda b, i: (b, 0, i)),
            pl.BlockSpec((1, 1, tile_n), lambda b, i: (b, 0, i)),
        ]

    kernel = functools.partial(_combined_loss_kernel, hw=HW,
                               pixels_per_tile=pixels_per_tile, ragged=ragged)

    partials = pl.pallas_call(
        kernel,
        out_shape=jax.ShapeDtypeStruct((B, n_tiles, 8, 128), jnp.float32),
        grid=(B, n_tiles),
        in_specs=in_specs,
        out_specs=pl.BlockSpec((1, 1, 8, 128), lambda b, i: (b, i, 0, 0)),
        compiler_params=pltpu.CompilerParams(
            dimension_semantics=("parallel", "parallel"),
            vmem_limit_bytes=48 * 1024 * 1024),
    )(p_in, t_in)

    # Fold the tiny per-chunk partials into the scalar loss in plain JAX.
    inter = jnp.sum(partials[:, :, 0, 0])
    ce_sum = jnp.sum(partials[:, :, 0, 1])
    n_f = jnp.float32(N)
    # sum(softmax) == sum(onehot) == N analytically -> dice denom is 2N + smooth.
    dice = (2.0 * inter + smooth) / (2.0 * n_f + smooth)
    dice_loss = 1.0 - dice
    ce_loss = ce_sum / n_f
    return dice_weight * dice_loss + ce_weight * ce_loss


def _reference_combined_loss(predictions, targets, *, dice_weight=0.5,
                             ce_weight=0.5, smooth=1e-6):
    C = predictions.shape[1]
    sm = jax.nn.softmax(predictions.astype(jnp.float32), axis=1)
    oh = jax.nn.one_hot(targets, C, dtype=jnp.float32)          # (B,H,W,C)
    oh = jnp.transpose(oh, (0, 3, 1, 2))                        # (B,C,H,W)
    inter = jnp.sum(sm * oh)
    dice = (2.0 * inter + smooth) / (jnp.sum(sm) + jnp.sum(oh) + smooth)
    dice_loss = 1.0 - dice
    logp = jax.nn.log_softmax(predictions.astype(jnp.float32), axis=1)
    ce = -jnp.mean(jnp.sum(logp * oh, axis=1))
    return dice_weight * dice_loss + ce_weight * ce


if __name__ == "__main__":
    key = jax.random.PRNGKey(0)

    # Case 1: H*W multiple of 128 -> packed (B, C, HW//128, 128) path.
    B, C, H, W = 2, 4, 16, 16
    kp, kt, key = jax.random.split(key, 3)
    predictions = jax.random.normal(kp, (B, C, H, W), dtype=jnp.float32)
    targets = jax.random.randint(kt, (B, H, W), 0, C, dtype=jnp.int32)
    loss = jax.block_until_ready(combined_loss(predictions, targets))
    ref = _reference_combined_loss(predictions, targets)
    assert jnp.allclose(loss, ref, rtol=1e-4, atol=1e-4), (loss, ref)

    # Case 2: H*W not a multiple of 128 -> ragged 3-D fallback with the
    # masked last tile (exercises the pl.when mask branch).
    B2, C2, H2, W2 = 2, 4, 20, 20
    kp2, kt2 = jax.random.split(key)
    predictions2 = jax.random.normal(kp2, (B2, C2, H2, W2), dtype=jnp.float32)
    targets2 = jax.random.randint(kt2, (B2, H2, W2), 0, C2, dtype=jnp.int32)
    loss2 = jax.block_until_ready(combined_loss(predictions2, targets2))
    ref2 = _reference_combined_loss(predictions2, targets2)
    assert jnp.allclose(loss2, ref2, rtol=1e-4, atol=1e-4), (loss2, ref2)

    print("KERNEL_OK")
</pallas_src>

<mosaic_0001>
module attributes {stable_mosaic.version = 11 : i64} {
  func.func @_combined_loss_kernel(%arg0: i32, %arg1: i32, %arg2: memref<1x4x2x128xf32, #tpu.memory_space<vmem>>, %arg3: memref<1x1x2x128xi32, #tpu.memory_space<vmem>>, %arg4: memref<1x1x8x128xf32, #tpu.memory_space<vmem>>) attributes {dimension_semantics = [#tpu.dimension_semantics<parallel>, #tpu.dimension_semantics<parallel>], iteration_bounds = array<i64: 2, 1>, scalar_prefetch = 0 : i64, scratch_operands = 0 : i64, tpu.core_type = #tpu.core_type<tc>, window_params = [{transform_indices = @transform_0, window_bounds = array<i64: 1, 4, 2, 128>}, {transform_indices = @transform_1, window_bounds = array<i64: 1, 1, 2, 128>}, {transform_indices = @transform_2, window_bounds = array<i64: 1, 1, 8, 128>}]} {
    %c0 = arith.constant 0 : index
    %c0_0 = arith.constant 0 : index
    %c0_1 = arith.constant 0 : index
    %c0_2 = arith.constant 0 : index
    %0 = vector.load %arg2[%c0, %c0_0, %c0_1, %c0_2] : memref<1x4x2x128xf32, #tpu.memory_space<vmem>>, vector<1x4x2x128xf32>
    %1 = vector.shape_cast %0 : vector<1x4x2x128xf32> to vector<4x2x128xf32>
    %c0_3 = arith.constant 0 : index
    %c0_4 = arith.constant 0 : index
    %c0_5 = arith.constant 0 : index
    %c0_6 = arith.constant 0 : index
    %2 = vector.load %arg3[%c0_3, %c0_4, %c0_5, %c0_6] : memref<1x1x2x128xi32, #tpu.memory_space<vmem>>, vector<1x1x2x128xi32>
    %3 = vector.shape_cast %2 : vector<1x1x2x128xi32> to vector<1x2x128xi32>
    %4 = tpu.iota {dimensions = array<i32: 0>} : vector<4x2x128xi32>
    %5 = vector.broadcast %3 : vector<1x2x128xi32> to vector<4x2x128xi32>
    %6 = arith.cmpi eq, %4, %5 : vector<4x2x128xi32>
    %cst = arith.constant 0.000000e+00 : f32
    %7 = vector.broadcast %cst : f32 to vector<4x2x128xf32>
    %8 = arith.select %6, %1, %7 : vector<4x2x128xi1>, vector<4x2x128xf32>
    %cst_7 = arith.constant dense<0.000000e+00> : vector<2x128xf32>
    %9 = vector.multi_reduction <add>, %8, %cst_7 [0] : vector<4x2x128xf32> to vector<2x128xf32>
    %10 = vector.shape_cast %9 : vector<2x128xf32> to vector<1x2x128xf32>
    %cst_8 = arith.constant dense<0xFF800000> : vector<2x128xf32>
    %11 = vector.multi_reduction <maximumf>, %1, %cst_8 [0] : vector<4x2x128xf32> to vector<2x128xf32>
    %12 = vector.shape_cast %11 : vector<2x128xf32> to vector<1x2x128xf32>
    %13 = vector.broadcast %12 : vector<1x2x128xf32> to vector<4x2x128xf32>
    %14 = arith.subf %1, %13 : vector<4x2x128xf32>
    %15 = math.exp %14 : vector<4x2x128xf32>
    %cst_9 = arith.constant dense<0.000000e+00> : vector<2x128xf32>
    %16 = vector.multi_reduction <add>, %15, %cst_9 [0] : vector<4x2x128xf32> to vector<2x128xf32>
    %17 = vector.shape_cast %16 : vector<2x128xf32> to vector<1x2x128xf32>
    %18 = arith.subf %10, %12 : vector<1x2x128xf32>
    %19 = math.exp %18 : vector<1x2x128xf32>
    %20 = arith.divf %19, %17 : vector<1x2x128xf32>
    %21 = math.log %17 : vector<1x2x128xf32>
    %22 = arith.addf %12, %21 : vector<1x2x128xf32>
    %23 = arith.subf %22, %10 : vector<1x2x128xf32>
    %24 = vector.shape_cast %20 : vector<1x2x128xf32> to vector<1x1x2x128xf32>
    %cst_10 = arith.constant dense<0.000000e+00> : vector<1xf32>
    %25 = vector.multi_reduction <add>, %24, %cst_10 [1, 2, 3] : vector<1x1x2x128xf32> to vector<1xf32>
    %26 = vector.shape_cast %25 : vector<1xf32> to vector<1x1x1x1xf32>
    %27 = vector.extract %26[0, 0, 0, 0] : f32 from vector<1x1x1x1xf32>
    %28 = vector.shape_cast %23 : vector<1x2x128xf32> to vector<1x1x2x128xf32>
    %cst_11 = arith.constant dense<0.000000e+00> : vector<1xf32>
    %29 = vector.multi_reduction <add>, %28, %cst_11 [1, 2, 3] : vector<1x1x2x128xf32> to vector<1xf32>
    %30 = vector.shape_cast %29 : vector<1xf32> to vector<1x1x1x1xf32>
    %31 = vector.extract %30[0, 0, 0, 0] : f32 from vector<1x1x1x1xf32>
    %32 = tpu.iota {dimensions = array<i32: 0>} : vector<8x128xi32>
    %33 = tpu.iota {dimensions = array<i32: 1>} : vector<8x128xi32>
    %c0_i32 = arith.constant 0 : i32
    %34 = vector.broadcast %c0_i32 : i32 to vector<8x128xi32>
    %35 = arith.cmpi eq, %32, %34 : vector<8x128xi32>
    %c0_i32_12 = arith.constant 0 : i32
    %36 = vector.broadcast %c0_i32_12 : i32 to vector<8x128xi32>
    %37 = arith.cmpi eq, %33, %36 : vector<8x128xi32>
    %38 = arith.andi %35, %37 : vector<8x128xi1>
    %c0_i32_13 = arith.constant 0 : i32
    %39 = vector.broadcast %c0_i32_13 : i32 to vector<8x128xi32>
    %40 = arith.cmpi eq, %32, %39 : vector<8x128xi32>
    %c1_i32 = arith.constant 1 : i32
    %41 = vector.broadcast %c1_i32 : i32 to vector<8x128xi32>
    %42 = arith.cmpi eq, %33, %41 : vector<8x128xi32>
    %43 = arith.andi %40, %42 : vector<8x128xi1>
    %cst_14 = arith.constant 0.000000e+00 : f32
    %44 = vector.broadcast %31 : f32 to vector<8x128xf32>
    %45 = vector.broadcast %cst_14 : f32 to vector<8x128xf32>
    %46 = arith.select %43, %44, %45 : vector<8x128xi1>, vector<8x128xf32>
    %47 = vector.broadcast %27 : f32 to vector<8x128xf32>
    %48 = arith.select %38, %47, %46 : vector<8x128xi1>, vector<8x128xf32>
    %49 = vector.shape_cast %48 : vector<8x128xf32> to vector<1x1x8x128xf32>
    %c0_15 = arith.constant 0 : index
    %c0_16 = arith.constant 0 : index
    %c0_17 = arith.constant 0 : index
    %c0_18 = arith.constant 0 : index
    %50 = vector.load %arg4[%c0_15, %c0_16, %c0_17, %c0_18] : memref<1x1x8x128xf32, #tpu.memory_space<vmem>>, vector<1x1x8x128xf32>
    tpu.vector_store %arg4[%c0_15, %c0_16, %c0_17, %c0_18], %49 {strides = array<i32>} : memref<1x1x8x128xf32, #tpu.memory_space<vmem>>, vector<1x1x8x128xf32>,
    return
  }
  func.func @transform_0(%arg0: i32, %arg1: i32) -> (i32, i32, i32, i32) {
    %c0_i32 = arith.constant 0 : i32
    %c0_i32_0 = arith.constant 0 : i32
    %c0_i32_1 = arith.constant 0 : i32
    return %arg0, %c0_i32, %arg1, %c0_i32_0 : i32, i32, i32, i32
  }
  func.func @transform_1(%arg0: i32, %arg1: i32) -> (i32, i32, i32, i32) {
    %c0_i32 = arith.constant 0 : i32
    %c0_i32_0 = arith.constant 0 : i32
    %c0_i32_1 = arith.constant 0 : i32
    return %arg0, %c0_i32, %arg1, %c0_i32_0 : i32, i32, i32, i32
  }
  func.func @transform_2(%arg0: i32, %arg1: i32) -> (i32, i32, i32, i32) {
    %c0_i32 = arith.constant 0 : i32
    %c0_i32_0 = arith.constant 0 : i32
    %c0_i32_1 = arith.constant 0 : i32
    return %arg0, %arg1, %c0_i32, %c0_i32_0 : i32, i32, i32, i32
  }
}

</mosaic_0001>

<bundles_post_ra>
// kernel: tpu_custom_call.1
= control target key start
LH: loop header
LB: loop body
LE: loop exit
PB: predicated region body
PF: predicated region fallthrough
CT: control target
= control target key end

     0   :  { %7 = vsyncpa [#allocation3], 0  ;;  %s874_s0 = inlined_call_operand.hbm [shape: f32[2,4,2,128], index: 0, kind: input, shape index: {}]   ;;  %s875_s1 = inlined_call_operand.hbm [shape: s32[2,1,2,128], index: 1, kind: input, shape index: {}]   ;;  %s876_s2 = inlined_call_operand.hbm [shape: f32[2,1,8,128], index: 2, kind: output, shape index: {}]  }
   0x1   :  { %9 = vsyncpa [#allocation3 + $0x1], 0 }
   0x2   :  { %10 = vsyncpa [#allocation6], 0 }
   0x3   :  { %12 = vsyncpa [#allocation6 + $0x1], 0 }
   0x4   :  { %13 = vsyncpa [#allocation4], 0 }
   0x5   :  { %15 = vsyncpa [#allocation4 + $0x1], 0  ;;  %s718_s9 = smov 0   ;;  %s720_s10 = smov 0  }
   0x6   :  { %s722_s11 = smov 0   ;;  %s724_s12 = smov 0  }
   0x7   :  { %s726_s13 = smov 0   ;;  %s728_s14 = smov 0  }
   0x8 LB: > { %s448_s15 = sadd.s32 4294967295, %s699_s14   ;;  %s449_s16 = sadd.s32 4294967294, %s699_s14   ;;  %s699_s14 = sphi %s728_s14, %s21_s14   ;;  %s695_s13 = sphi %s726_s13, %s886_s13   ;;  %s691_s12 = sphi %s724_s12, %s885_s12   ;;  %s687_s11 = sphi %s722_s11, %s884_s11   ;;  %s683_s10 = sphi %s720_s10, %s883_s10   ;;  %s679_s9 = sphi %s718_s9, %s882_s9  }
   0x9   : > { %s33_s17 = sadd.s32 1, %s695_s13  ;;  %s42_s18 = sadd.s32 1, %s687_s11 }
   0xa   : > { %p35_p0 = scmp.ge.s32.totalorder %s33_s17, 2  ;;  %p49_p1 = scmp.ne.s32.totalorder %s687_s11, %s683_s10 }
   0xb   : > { %p50_p2 = scmp.eq.s32.totalorder %s699_s14, 0  ;;  %p55_p3 = scmp.ne.s32.totalorder %s683_s10, %s679_s9 }
   0xc   : > { %s888_s17 = smov (%p35_p0, %s33_s17), 0  ;;  %p56_p5 = scmp.eq.s32.totalorder %s448_s15, 0 }
   0xd   : > { %p759_p4 = por %p50_p2, %p49_p1  ;;  %s37_s20 = ssub.s32 %s695_s13, %s888_s17 }
   0xe   : > { %p109_p6 = scmp.eq.s32.totalorder %s448_s15, 1  ;;  %p40_p7 = scmp.eq.s32.totalorder %s37_s20, 0 }
   0xf   : > { %p765_p8 = por %p56_p5, %p55_p3  ;;  %p115_p10 = scmp.eq.s32.totalorder %s449_s16, 1 }
  0x10   : > { %p769_p9 = por %p109_p6, %p49_p1  ;;  %p451_p12 = scmp.ge.s32.totalorder %s699_s14, 2 }
  0x11   : > { %s774_s23 = scalar_select %p40_p7, %s687_s11, %s42_s18  }
  0x12   : > { %p776_p11 = por %p115_p10, %p55_p3  ;;  %p487_p13 = scmp.lt.s32.totalorder %s699_s14, 2 }
  0x13   : > { %s135_s25 = sand.u32 1, %s687_s11   ;;  %s465_s27 = sshll.u32 %s695_s13, 3 }
  0x14   : > { %s452_s26 = sshll.u32 %s135_s25, 3  ;;  %s145_s30 = scalar_lea.hbm %s874_s0, %s465_s27 }
  0x15   : > { %s139_s3 = scalar_lea.vmem [#allocation2], %s452_s26  ;;  %s146_s5 = sshll.u32 %s145_s30, 4  ;;  %s147_s5 = int_to_ptr.hbm [resolvable:$true] %s146_s5 }
  0x16   : > { %s148_s4 = sshll.u32 %s139_s3, 4  ;;  %p789_p0 = pnand %p487_p13, %p759_p4  ;;  %s149_s4 = int_to_ptr.vmem [resolvable:$true] %s148_s4 }
  0x17   : > { %p457_p1 = scmp.ge.s32.totalorder %s699_s14, 1  ;;  %s136_s7 = scalar_lea.sflag [#allocation3], %s135_s25 }
  0x18   : > { %s701_s8 = smov 32   ;;  %s702_s15 = smov 2  }
  0x19   : > { %479 = dma.hbm_to_vmem [thread:$0]  (!%p789_p0), %s147_s5, 128, %s149_s4, %s136_s7, %s701_s8, %s701_s8, %s702_s15  }
  0x1a   : > { %p176_p2 = scmp.lt.s32.totalorder %s699_s14, 3  ;;  %s455_s16 = sshll.u32 %s135_s25, 1 }
  0x1b   : > { %s456_s18 = sshll.u32 %s695_s13, 1  ;;  %s162_s27 = scalar_lea.vmem [#allocation5], %s455_s16 }
  0x1c   : > { %p177_p3 = pnand %p457_p1, %p176_p2  ;;  %s167_s19 = scalar_lea.hbm %s875_s1, %s456_s18 }
  0x1d   : > { %s171_s28 = sshll.u32 %s162_s27, 4  ;;  %s169_s29 = sshll.u32 %s167_s19, 4  ;;  %s172_s28 = int_to_ptr.vmem [resolvable:$true] %s171_s28  ;;  %s170_s29 = int_to_ptr.hbm [resolvable:$true] %s169_s29 }
  0x1e   : > { %s159_s30 = scalar_lea.sflag [#allocation6], %s135_s25  ;;  %180 = sbr.rel (%p177_p3) target bundleno = 277 (0x115), region = 28 }
  0x1f   : > { %482 = dma.hbm_to_vmem [thread:$0]  (!%p789_p0), %s170_s29, 32, %s172_s28, %s159_s30  }
  0x20   : > { %s804_s3 = sand.u32 (!%p177_p3), 1, %s683_s10  }
  0x21   : > { %s458_s4 = sshll.u32 (!%p177_p3), %s804_s3, 3  ;;  %s183_s5 = scalar_lea.sflag (!%p177_p3), [#allocation3], %s804_s3 }
  0x22   : > { %s186_s7 = scalar_lea.vmem (!%p177_p3), [#allocation2], %s458_s4 }
  0x23   : > { %666 = dma.done.wait (%p765_p8), %s183_s5, 128  }
  0x24   : > { %668 = vsyncadd (%p765_p8), %s183_s5, 4294967168  ;;  %s459_s25 = sshll.u32 %s804_s3, 1  ;;  %s193_s6 = scalar_lea.sflag [#allocation6], %s804_s3 }
  0x25   : > { %s196_s8 = scalar_lea.vmem [#allocation5], %s459_s25 }
  0x26   : > { %670 = dma.done.wait (%p765_p8), %s193_s6, 32  }
  0x27   : > { %672 = vsyncadd (%p765_p8), %s193_s6, 4294967264  ;;  %vm236_vm0 = vcmask 1041408   ;;  %v223_v0 = vld [vmem:[%s186_s7] sm:$0x3]  ;;  %v224_v1 = vld [vmem:[%s186_s7 + $0x2] sm:$0x3] }
  0x28   : > { %v225_v2 = vld [vmem:[%s186_s7 + $0x4] sm:$0x3]  ;;  %v226_v3 = vld [vmem:[%s186_s7 + $0x6] sm:$0x3]  ;;  %v244_v4 = vsel %vm236_vm0, %v223_v0, -inf  ;;  %v245_v5 = vsel %vm236_vm0, %v224_v1, -inf }
  0x29   : > { %v227_v6 = vld [vmem:[%s196_s8] sm:$0x3]  ;;  %v246_v7 = vsel %vm236_vm0, %v225_v2, -inf  ;;  %v247_v8 = vsel %vm236_vm0, %v226_v3, -inf  ;;  %v248_v9 = vmax.f32 %v244_v4, %v245_v5  ;;  %s462_s21 = sshll.u32 %s691_s12, 3  ;;  %s222_s20 = scalar_lea.vmem [#allocation7], %s458_s4 }
  0x2a   : > { %v249_v10 = vmax.f32 %v246_v7, %v247_v8  ;;  %vm228_vm1 = vcmp.eq.s32.totalorder %v227_v6, 0  ;;  %vm229_vm2 = vcmp.eq.s32.totalorder %v227_v6, 1  ;;  %vm230_vm3 = vcmp.eq.s32.totalorder %v227_v6, 2  ;;  %s338_s18 = scalar_lea.hbm %s876_s2, %s462_s21  ;;  %s340_s26 = sshll.u32 %s222_s20, 4  ;;  %s341_s26 = int_to_ptr.vmem [resolvable:$true] %s340_s26 }
  0x2b   : > { %v232_v16 = vsel %vm228_vm1, %v223_v0, 0.0  ;;  %v233_v17 = vsel %vm229_vm2, %v224_v1, 0.0  ;;  %v234_v24 = vsel %vm230_vm3, %v225_v2, 0.0  ;;  %vm231_vm4 = vcmp.eq.s32.totalorder %v227_v6, 3  ;;  %s342_s27 = sshll.u32 %s338_s18, 4  ;;  %s327_s12 = scalar_lea.sflag [#allocation4], %s804_s3  ;;  %s343_s27 = int_to_ptr.hbm [resolvable:$true] %s342_s27 }
  0x2c   : > { %v250_v11 = vmax.f32 %v248_v9, %v249_v10  ;;  %v237_v22 = vsel %vm236_vm0, %v232_v16, 0.0  ;;  %v238_v23 = vsel %vm236_vm0, %v233_v17, 0.0  ;;  %v240_v26 = vsel %vm236_vm0, %v234_v24, 0.0  ;;  %s627_s29 = sshra.s32 %s343_s27, 4  ;;  %s633_s7 = scalar_lea.hbm %s876_s2, 16  ;;  %s628_s29 = int_to_ptr.hbm [resolvable:$true] %s627_s29 }
  0x2d   : > { %v239_v25 = vadd.f32 %v238_v23, %v237_v22  ;;  %v235_v27 = vsel %vm231_vm4, %v226_v3, 0.0  ;;  %s629_s30 = scalar_lea.hbm %s628_s29, 8  ;;  %p634_p7 = scmp.lt.s32.totalorder %s628_s29, %s876_s2 }
  0x2e   : > { %v251_v12 = vsub.f32 %v223_v0, %v250_v11  ;;  %v252_v13 = vsub.f32 %v224_v1, %v250_v11  ;;  %v253_v14 = vsub.f32 %v225_v2, %v250_v11  ;;  %v254_v15 = vsub.f32 %v226_v3, %v250_v11  ;;  %p630_p4 = scmp.ne.s32.totalorder %s628_s29, %s629_s30  ;;  %p635_p8 = scmp.lt.s32.totalorder %s633_s7, %s629_s30 }
  0x2f   : > { %v241_v30 = vadd.f32 %v240_v26, %v239_v25  ;;  %v242_v33 = vsel %vm236_vm0, %v235_v27, 0.0 }
  0x30   : > { %v255_v18 = vmul.f32 1.442695, %v251_v12  ;;  %v257_v19 = vmul.f32 1.442695, %v252_v13  ;;  %v259_v20 = vmul.f32 1.442695, %v253_v14  ;;  %v312_v12 = vlaneseq  ;;  %p631_p5 = pnand %p630_p4, %p769_p9  ;;  %p636_p10 = por %p635_p8, %p634_p7 }
  0x31   : > { %v261_v21 = vmul.f32 1.442695, %v254_v15  ;;  %v243_v39 = vadd.f32 %v242_v33, %v241_v30 }
  0x32   : > { %539 = vpow2.f32 %v255_v18  ;;  %v313_v13 = vshrl.u32 %v312_v12, 7  ;;  %v315_v14 = vand.u32 127, %v312_v12  ;;  %p632_p6 = pneg %p631_p5 }
  0x33   : > { %541 = vpow2.f32 %v257_v19  ;;  %v270_v42 = vsub.f32 %v243_v39, %v250_v11 }
  0x34   : > { %543 = vpow2.f32 %v259_v20  ;;  %vm316_vm9 = vcmp.eq.s32.totalorder %v313_v13, 0  ;;  %vm319_vm10 = vcmp.eq.s32.totalorder %v315_v14, 1  ;;  %vm317_vm11 = vcmp.eq.s32.totalorder %v315_v14, 0  ;;  %p637_p13 = pnand %p636_p10, %p632_p6 }
  0x35   : > { %545 = vpow2.f32 %v261_v21  ;;  %v271_v43 = vmul.f32 1.442695, %v270_v42  ;;  %vm320_vm12 = vmand %vm316_vm9, %vm319_vm10 }
  0x36   : > { %vm318_vm13 = vmand %vm316_vm9, %vm317_vm11 }
  0x38   : > { %v540_v28 = vpop.eup %539 }
  0x39   : > { %v542_v29 = vpop.eup %541  ;;  %v263_v31 = vsel %vm236_vm0, %v540_v28, 0.0 }
  0x3a   : > { %v544_v32 = vpop.eup %543  ;;  %v264_v34 = vsel %vm236_vm0, %v542_v29, 0.0 }
  0x3b   : > { %v546_v35 = vpop.eup %545  ;;  %v265_v36 = vadd.f32 %v264_v34, %v263_v31  ;;  %v266_v37 = vsel %vm236_vm0, %v544_v32, 0.0 }
  0x3c   : > { %v268_v38 = vsel %vm236_vm0, %v546_v35, 0.0 }
  0x3d   : > { %v267_v40 = vadd.f32 %v266_v37, %v265_v36 }
  0x3f   : > { %v269_v41 = vadd.f32 %v268_v38, %v267_v40 }
  0x41   : > { %547 = vrcp.f32 %v269_v41  ;;  %v284_v46 = vand.u32 2147483648, %v269_v41  ;;  %vm278_vm5 = vweird.f32 %v269_v41  ;;  %v282_v48 = vand.u32 2147483647, %v269_v41 }
  0x42   : > { %549 = vlog2.f32 %v269_v41 }
  0x43   : > { %551 = vpow2.f32 %v271_v43  ;;  %v285_v51 = vor.u32 1.1754944e-38, %v284_v46  ;;  %vm283_vm8 = vcmp.eq.f32.partialorder %v282_v48, 8.507059e+37 }
  0x47   : > { %v548_v44 = vpop.eup %547 }
  0x48   : > { %v274_v45 = vmul.f32 %v548_v44, %v269_v41  ;;  %vm279_vm6 = vweird.f32 %v548_v44  ;;  %v550_v49 = vpop.eup %549 }
  0x49   : > { %vm280_vm7 = vmor %vm278_vm5, %vm279_vm6  ;;  %v289_v53 = vmul.f32 0.6931472, %v550_v49  ;;  %v552_v54 = vpop.eup %551 }
  0x4a   : > { %v275_v47 = vsub.f32 1.0, %v274_v45 }
  0x4b   : > { %v290_v58 = vadd.f32 %v289_v53, %v250_v11 }
  0x4c   : > { %v276_v50 = vmul.f32 %v548_v44, %v275_v47 }
  0x4d   : > { %v291_v60 = vsub.f32 %v290_v58, %v243_v39 }
  0x4e   : > { %v277_v52 = vadd.f32 %v548_v44, %v276_v50 }
  0x4f   : > { %v302_v61 = vsel %vm236_vm0, %v291_v60, 0.0 }
  0x50   : > { %v281_v55 = vsel %vm280_vm7, %v548_v44, %v277_v52 }
  0x51   : > { %v286_v56 = vsel %vm283_vm8, %v285_v51, %v281_v55 }
  0x52   : > { %v287_v57 = vmul.f32 %v552_v54, %v286_v56 }
  0x54   : > { %v292_v59 = vsel %vm236_vm0, %v287_v57, 0.0 }
  0x55   : > { %293 = vadd.xlane.f32.xlu0 %v292_v59 }
  0x5d   : > { %303 = vadd.xlane.f32.xlu0 %v302_v61 }
  0xc8   : > { %v294_v62 = vpop.xlane.xlu0 %293 }
  0xc9   : > { %v295_v63 = vrot.slane %v294_v62, 4 }
  0xcb   : > { %v296_v0 = vadd.f32 %v295_v63, %v294_v62 }
  0xcd   : > { %v297_v1 = vrot.slane %v296_v0, 2 }
  0xcf   : > { %v298_v2 = vadd.f32 %v297_v1, %v296_v0 }
  0xd0   : > { %v304_v3 = vpop.xlane.xlu0 %303 }
  0xd1   : > { %v305_v4 = vrot.slane %v304_v3, 4  ;;  %v299_v5 = vrot.slane %v298_v2, 1 }
  0xd3   : > { %v306_v6 = vadd.f32 %v305_v4, %v304_v3  ;;  %v300_v7 = vadd.f32 %v299_v5, %v298_v2 }
  0xd5   : > { %v307_v8 = vrot.slane %v306_v6, 2  ;;  %466 = vpush %v300_v7 }
  0xd7   : > { %v308_v9 = vadd.f32 %v307_v8, %v306_v6 }
  0xd9   : > { %v309_v10 = vrot.slane %v308_v9, 1 }
  0xdb   : > { %v310_v11 = vadd.f32 %v309_v10, %v308_v9 }
  0xdd   : > { %468 = vpush %v310_v11 }
 0x106   : > { %s467_s19 = spop %466 }
 0x107   : > { %v323_v16 = vstv %s467_s19 }
 0x10e   : > { %s469_s28 = spop %468 }
 0x10f   : > { %v321_v15 = vstv %s469_s28 }
 0x110   : > { %v322_v17 = vsel %vm320_vm12, %v321_v15, 0.0 }
 0x111   : > { %v324_v18 = vsel %vm318_vm13, %v323_v16, %v322_v17 }
 0x112   : > { %325 = vst [vmem:[%s222_s20] sm:$0xff] %v324_v18 }
 0x113   : > { %640 = shalt.err (!%p637_p13)
}
 0x114   : > { %474 = dma.vmem_to_hbm [thread:$0]  (%p769_p9), %s341_s26, 128, %s343_s27, %s327_s12  }
 0x115 PF: > { %s354_s3 = sand.u32 1, %s679_s9   ;;  %p484_p0 = pnand %p451_p12, %p776_p11 }
 0x116   : > { %s355_s8 = scalar_lea.sflag [#allocation4], %s354_s3 }
 0x117   : > { %p485_p1 = pneg %p484_p0 }
 0x119   : > { %674 = dma.done.wait (%p485_p1), %s355_s8, 128  }
 0x11a   : > { %676 = vsyncadd (%p485_p1), %s355_s8, 4294967168  ;;  %s21_s14 = sadd.s32 1, %s699_s14   ;;  %s882_s9 = smov %s683_s10 }
 0x11b   : > { %p18_p2 = scmp.ge.s32.totalorder %s21_s14, 4   ;;  %s883_s10 = smov %s687_s11 }
 0x11c   : > { %s884_s11 = smov %s774_s23  ;;  %s885_s12 = smov %s695_s13 }
 0x11d   : > { %s886_s13 = smov %s888_s17  ;;  %20 = sbr.rel (!%p18_p2) target bundleno = 8 (0x8), region = 86 }
 0x122   :  { %361 = vsyncpa [#allocation3], 1 }
 0x123   :  { %363 = vsyncpa [#allocation3 + $0x1], 1 }
 0x124   :  { %364 = vsyncpa [#allocation6], 1 }
 0x125   :  { %366 = vsyncpa [#allocation6 + $0x1], 1 }
 0x126   :  { %367 = vsyncpa [#allocation4], 1 }
 0x127   :  { %369 = vsyncpa [#allocation4 + $0x1], 1 }

</bundles_post_ra>
